<compile_context>
chip_gen: v7x
topology: tpu7x:2x2x1
jax: 0.10.0
libtpu: 0.0.40
codegen_flags: <defaults>
</compile_context>

<pallas_src>
import functools

import jax
import jax.numpy as jnp
from jax.experimental import pallas as pl
from jax.experimental.pallas import tpu as pltpu


# ----------------------------------------------------------------- helpers --
def _pick_row_tile(n, target):
    """Largest multiple of 16 that divides n and is <= target; else full n."""
    if n <= target:
        return n
    t = (target // 16) * 16
    while t >= 16:
        if n % t == 0:
            return t
        t -= 16
    return n


def _compiler_params(dims, vmem_bytes):
    # Explicit scoped-VMEM limit sized to the actual tile footprint (2x
    # headroom for double-buffering), clamped to stay safe on v5e..v7x.
    limit = int(min(max(2 * vmem_bytes, 8 << 20), 48 << 20))
    return pltpu.CompilerParams(dimension_semantics=dims,
                                vmem_limit_bytes=limit)


# ---------------------------------------------- projection + attn scores ----
def _proj_kernel(x_ref, w_ref, al_ref, ar_ref, proj_ref, el_ref, er_ref, *,
                 num_heads, out_feats):
    # x: [tm, Din], w: [Din, H*F], al/ar: [1, H*F]
    proj = jnp.dot(x_ref[...], w_ref[...],
                   preferred_element_type=jnp.float32)          # [tm, H*F] f32
    proj_ref[...] = proj.astype(proj_ref.dtype)

    wl = proj * al_ref[...].astype(jnp.float32)
    wr = proj * ar_ref[...].astype(jnp.float32)
    el_cols, er_cols = [], []
    for h in range(num_heads):                                  # H is tiny/static
        s = h * out_feats
        el_cols.append(jnp.sum(wl[:, s:s + out_feats], axis=-1, keepdims=True))
        er_cols.append(jnp.sum(wr[:, s:s + out_feats], axis=-1, keepdims=True))
    el_ref[...] = el_cols[0] if num_heads == 1 else jnp.concatenate(el_cols, -1)
    er_ref[...] = er_cols[0] if num_heads == 1 else jnp.concatenate(er_cols, -1)


def _project(x, w, attn_l, attn_r, num_heads, out_feats):
    n, din = x.shape
    hf = num_heads * out_feats
    al = attn_l.reshape(1, hf).astype(jnp.float32)
    ar = attn_r.reshape(1, hf).astype(jnp.float32)

    tm = _pick_row_tile(n, 256)
    grid = (n // tm,)
    vmem = (2 * (tm * din * x.dtype.itemsize + tm * hf * x.dtype.itemsize
                 + 2 * tm * num_heads * 4)
            + din * hf * w.dtype.itemsize + 2 * hf * 4)

    kernel = functools.partial(_proj_kernel, num_heads=num_heads,
                               out_feats=out_feats)
    proj, el, er = pl.pallas_call(
        kernel,
        out_shape=(jax.ShapeDtypeStruct((n, hf), x.dtype),
                   jax.ShapeDtypeStruct((n, num_heads), jnp.float32),
                   jax.ShapeDtypeStruct((n, num_heads), jnp.float32)),
        grid=grid,
        in_specs=[
            pl.BlockSpec((tm, din), lambda i: (i, 0)),
            pl.BlockSpec((din, hf), lambda i: (0, 0)),
            pl.BlockSpec((1, hf), lambda i: (0, 0)),
            pl.BlockSpec((1, hf), lambda i: (0, 0)),
        ],
        out_specs=(pl.BlockSpec((tm, hf), lambda i: (i, 0)),
                   pl.BlockSpec((tm, num_heads), lambda i: (i, 0)),
                   pl.BlockSpec((tm, num_heads), lambda i: (i, 0))),
        compiler_params=_compiler_params(("parallel",), vmem),
    )(x, w, al, ar)
    return proj, el, er


# ---------------------------------------------------- attention (dst-tiled) -
def _gat_attn_kernel(feat_ref, el_ref, er_ref, adj_ref, bias_ref, out_ref, *,
                     num_heads, out_feats, negative_slope, apply_elu):
    # feat: [N, H*F] (resident), el: [H, N] (resident), er: [tdst, H],
    # adj: [tdst, N] (streamed mask), bias: [1, H*F], out: [tdst, H*F]
    mask = adj_ref[...].astype(jnp.float32) > 0.0               # [tdst, N]
    neg_inf = jnp.float32(-1e30)

    head_outs = []
    for h in range(num_heads):
        s = h * out_feats
        el_row = el_ref[h:h + 1, :]                              # [1, N]   f32
        er_col = er_ref[:, h:h + 1]                              # [tdst,1] f32
        e = er_col + el_row                                      # [tdst, N]
        e = jnp.where(e >= 0, e, negative_slope * e)             # LeakyReLU
        e = jnp.where(mask, e, neg_inf)
        m = jnp.max(e, axis=-1, keepdims=True)                   # [tdst, 1]
        p = jnp.exp(e - m)                      # masked entries underflow to 0
        denom = jnp.sum(p, axis=-1, keepdims=True)               # [tdst, 1]

        feat_h = feat_ref[:, s:s + out_feats]                    # [N, F]
        acc = jnp.dot(p.astype(feat_h.dtype), feat_h,
                      preferred_element_type=jnp.float32)        # [tdst, F]
        # normalize AFTER the AV matmul: F multiplies/row, EUP reciprocal
        acc = acc * pl.reciprocal(denom, approx=True)
        head_outs.append(acc)

    out = head_outs[0] if num_heads == 1 else jnp.concatenate(head_outs, -1)
    out = out + bias_ref[...].astype(jnp.float32)                # fused bias
    if apply_elu:                                                # fused ELU
        out = jnp.where(out > 0, out, jnp.exp(out) - 1.0)
    out_ref[...] = out.astype(out_ref.dtype)


def gat_conv(h, w, attn_l, attn_r, bias, adj, num_heads, out_feats,
             negative_slope=0.2, apply_elu=False):
    """One GATConv layer. h: [N, in_dim] -> [N, num_heads * out_feats]."""
    n = h.shape[0]
    hf = num_heads * out_feats

    proj, el, er = _project(h, w, attn_l, attn_r, num_heads, out_feats)
    el_t = el.T                       # [H, N] — tiny O(N*H) relayout so source
    bias2d = bias.reshape(1, hf)      #            scores are lane-dense rows

    tdst = _pick_row_tile(n, 512)
    grid = (n // tdst,)
    vmem = (n * hf * proj.dtype.itemsize          # resident features
            + num_heads * n * 4                   # resident el
            + 2 * (tdst * n * adj.dtype.itemsize  # streamed adj (dbl-buffered)
                   + tdst * num_heads * 4
                   + tdst * hf * proj.dtype.itemsize)
            + hf * 4)

    kernel = functools.partial(_gat_attn_kernel, num_heads=num_heads,
                               out_feats=out_feats,
                               negative_slope=negative_slope,
                               apply_elu=apply_elu)
    out = pl.pallas_call(
        kernel,
        out_shape=jax.ShapeDtypeStruct((n, hf), h.dtype),
        grid=grid,
        in_specs=[
            pl.BlockSpec((n, hf), lambda j: (0, 0)),             # feat (resident)
            pl.BlockSpec((num_heads, n), lambda j: (0, 0)),      # el   (resident)
            pl.BlockSpec((tdst, num_heads), lambda j: (j, 0)),   # er   (per tile)
            pl.BlockSpec((tdst, n), lambda j: (j, 0)),           # adj  (streamed)
            pl.BlockSpec((1, hf), lambda j: (0, 0)),             # bias
        ],
        out_specs=pl.BlockSpec((tdst, hf), lambda j: (j, 0)),    # lane-dense slab
        compiler_params=_compiler_params(("parallel",), vmem),
    )(proj, el_t, er, adj, bias2d)
    return out


def gat_forward(params, adj, h):
    # layer1 (+fused ELU) -> layer2 ; output is already the squeezed [N, out].
    h1 = gat_conv(h, params["w1"], params["al1"], params["ar1"], params["b1"],
                  adj, params["num_heads"], params["hidden_dim"],
                  apply_elu=True)
    h2 = gat_conv(h1, params["w2"], params["al2"], params["ar2"], params["b2"],
                  adj, 1, params["out_dim"], apply_elu=False)
    # TODO(synk): self.last_act is None in this configuration; no-op here.
    return h2


# -------------------------------------------------------- pure-JAX reference -
def _gat_conv_ref(h, w, attn_l, attn_r, bias, adj, num_heads, out_feats,
                  negative_slope=0.2):
    n = h.shape[0]
    feat = (h @ w).reshape(n, num_heads, out_feats)
    el = jnp.sum(feat * attn_l.reshape(1, num_heads, out_feats), axis=-1)
    er = jnp.sum(feat * attn_r.reshape(1, num_heads, out_feats), axis=-1)
    e = el[None, :, :] + er[:, None, :]                  # [dst, src, H]
    e = jnp.where(e >= 0, e, negative_slope * e)
    mask = (adj > 0)[:, :, None]
    e = jnp.where(mask, e, -1e30)
    e = e - jnp.max(e, axis=1, keepdims=True)
    p = jnp.where(mask, jnp.exp(e), 0.0)
    alpha = p / jnp.sum(p, axis=1, keepdims=True)
    out = jnp.einsum("vuh,uhf->vhf", alpha, feat)
    return out + bias.reshape(1, num_heads, out_feats)


def _gat_forward_ref(params, adj, h):
    h1 = _gat_conv_ref(h, params["w1"], params["al1"], params["ar1"],
                       params["b1"], adj, params["num_heads"],
                       params["hidden_dim"])
    h1 = h1.reshape(h1.shape[0], -1)
    h1 = jnp.where(h1 > 0, h1, jnp.exp(h1) - 1.0)
    h2 = _gat_conv_ref(h1, params["w2"], params["al2"], params["ar2"],
                       params["b2"], adj, 1, params["out_dim"])
    return jnp.squeeze(h2, axis=1)


if __name__ == "__main__":
    key = jax.random.PRNGKey(0)
    N, in_dim, hidden_dim, out_dim, num_heads = 16, 8, 8, 4, 2
    ks = jax.random.split(key, 10)

    h = jax.random.normal(ks[0], (N, in_dim), jnp.float32)

    # random directed graph + self-loops, adj[dst, src].  The kernel only uses
    # adj as a mask, so store it as bf16 (0/1 are exact) to halve O(N^2) HBM.
    adj_f = (jax.random.uniform(ks[1], (N, N)) < 0.3).astype(jnp.float32)
    adj_f = jnp.maximum(adj_f, jnp.eye(N, dtype=jnp.float32))
    adj = adj_f.astype(jnp.bfloat16)

    params = {
        "num_heads": num_heads, "hidden_dim": hidden_dim, "out_dim": out_dim,
        "w1": 0.1 * jax.random.normal(ks[2], (in_dim, num_heads * hidden_dim), jnp.float32),
        "al1": 0.1 * jax.random.normal(ks[3], (num_heads, 1, hidden_dim), jnp.float32),
        "ar1": 0.1 * jax.random.normal(ks[4], (num_heads, 1, hidden_dim), jnp.float32),
        "b1": 0.1 * jax.random.normal(ks[5], (num_heads * hidden_dim,), jnp.float32),
        "w2": 0.1 * jax.random.normal(ks[6], (num_heads * hidden_dim, out_dim), jnp.float32),
        "al2": 0.1 * jax.random.normal(ks[7], (1, 1, out_dim), jnp.float32),
        "ar2": 0.1 * jax.random.normal(ks[8], (1, 1, out_dim), jnp.float32),
        "b2": 0.1 * jax.random.normal(ks[9], (out_dim,), jnp.float32),
    }

    out = gat_forward(params, adj, h)
    jax.block_until_ready(out)

    ref = _gat_forward_ref(params, adj, h)
    assert out.shape == (N, out_dim)
    # tolerance relaxed slightly vs 1e-4: softmax normalization uses the EUP
    # approximate reciprocal (pl.reciprocal(..., approx=True)).
    assert jnp.allclose(out, ref, atol=2e-3, rtol=2e-3), "mismatch vs JAX reference"

    print("KERNEL_OK")
</pallas_src>

<mosaic_0001>
module attributes {stable_mosaic.version = 11 : i64} {
  func.func @_proj_kernel(%arg0: i32, %arg1: memref<16x8xf32, #tpu.memory_space<vmem>>, %arg2: memref<8x16xf32, #tpu.memory_space<vmem>>, %arg3: memref<1x16xf32, #tpu.memory_space<vmem>>, %arg4: memref<1x16xf32, #tpu.memory_space<vmem>>, %arg5: memref<16x16xf32, #tpu.memory_space<vmem>>, %arg6: memref<16x2xf32, #tpu.memory_space<vmem>>, %arg7: memref<16x2xf32, #tpu.memory_space<vmem>>) attributes {dimension_semantics = [#tpu.dimension_semantics<parallel>], iteration_bounds = array<i64: 1>, scalar_prefetch = 0 : i64, scratch_operands = 0 : i64, tpu.core_type = #tpu.core_type<tc>, window_params = [{transform_indices = @transform_0, window_bounds = array<i64: 16, 8>}, {pipeline_mode = #tpu.pipeline_mode<synchronous>, transform_indices = @transform_1, window_bounds = array<i64: 8, 16>}, {pipeline_mode = #tpu.pipeline_mode<synchronous>, transform_indices = @transform_2, window_bounds = array<i64: 1, 16>}, {pipeline_mode = #tpu.pipeline_mode<synchronous>, transform_indices = @transform_3, window_bounds = array<i64: 1, 16>}, {transform_indices = @transform_4, window_bounds = array<i64: 16, 16>}, {transform_indices = @transform_5, window_bounds = array<i64: 16, 2>}, {transform_indices = @transform_6, window_bounds = array<i64: 16, 2>}]} {
    %c0 = arith.constant 0 : index
    %c0_0 = arith.constant 0 : index
    %0 = vector.load %arg1[%c0, %c0_0] : memref<16x8xf32, #tpu.memory_space<vmem>>, vector<16x8xf32>
    %c0_1 = arith.constant 0 : index
    %c0_2 = arith.constant 0 : index
    %1 = vector.load %arg2[%c0_1, %c0_2] : memref<8x16xf32, #tpu.memory_space<vmem>>, vector<8x16xf32>
    %cst = arith.constant dense<0.000000e+00> : vector<16x16xf32>
    %2 = tpu.matmul %0, %1, %cst {dimension_numbers = #tpu.dot_dimension_numbers<[1], [0], [0], [1], [0, 0, 1, 1], [], []>} : vector<16x8xf32>, vector<8x16xf32>, vector<16x16xf32> -> vector<16x16xf32>
    %c0_3 = arith.constant 0 : index
    %c0_4 = arith.constant 0 : index
    %3 = vector.load %arg5[%c0_3, %c0_4] : memref<16x16xf32, #tpu.memory_space<vmem>>, vector<16x16xf32>
    tpu.vector_store %arg5[%c0_3, %c0_4], %2 {strides = array<i32>} : memref<16x16xf32, #tpu.memory_space<vmem>>, vector<16x16xf32>,
    %c0_5 = arith.constant 0 : index
    %c0_6 = arith.constant 0 : index
    %4 = vector.load %arg3[%c0_5, %c0_6] : memref<1x16xf32, #tpu.memory_space<vmem>>, vector<1x16xf32>
    %5 = vector.broadcast %4 : vector<1x16xf32> to vector<16x16xf32>
    %6 = arith.mulf %2, %5 : vector<16x16xf32>
    %c0_7 = arith.constant 0 : index
    %c0_8 = arith.constant 0 : index
    %7 = vector.load %arg4[%c0_7, %c0_8] : memref<1x16xf32, #tpu.memory_space<vmem>>, vector<1x16xf32>
    %8 = vector.broadcast %7 : vector<1x16xf32> to vector<16x16xf32>
    %9 = arith.mulf %2, %8 : vector<16x16xf32>
    %10 = vector.extract_strided_slice %6 {offsets = [0, 0], sizes = [16, 8], strides = [1, 1]} : vector<16x16xf32> to vector<16x8xf32>
    %cst_9 = arith.constant dense<0.000000e+00> : vector<16xf32>
    %11 = vector.multi_reduction <add>, %10, %cst_9 [1] : vector<16x8xf32> to vector<16xf32>
    %12 = vector.shape_cast %11 : vector<16xf32> to vector<16x1xf32>
    %13 = vector.extract_strided_slice %9 {offsets = [0, 0], sizes = [16, 8], strides = [1, 1]} : vector<16x16xf32> to vector<16x8xf32>
    %cst_10 = arith.constant dense<0.000000e+00> : vector<16xf32>
    %14 = vector.multi_reduction <add>, %13, %cst_10 [1] : vector<16x8xf32> to vector<16xf32>
    %15 = vector.shape_cast %14 : vector<16xf32> to vector<16x1xf32>
    %16 = vector.extract_strided_slice %6 {offsets = [0, 8], sizes = [16, 8], strides = [1, 1]} : vector<16x16xf32> to vector<16x8xf32>
    %cst_11 = arith.constant dense<0.000000e+00> : vector<16xf32>
    %17 = vector.multi_reduction <add>, %16, %cst_11 [1] : vector<16x8xf32> to vector<16xf32>
    %18 = vector.shape_cast %17 : vector<16xf32> to vector<16x1xf32>
    %19 = vector.extract_strided_slice %9 {offsets = [0, 8], sizes = [16, 8], strides = [1, 1]} : vector<16x16xf32> to vector<16x8xf32>
    %cst_12 = arith.constant dense<0.000000e+00> : vector<16xf32>
    %20 = vector.multi_reduction <add>, %19, %cst_12 [1] : vector<16x8xf32> to vector<16xf32>
    %21 = vector.shape_cast %20 : vector<16xf32> to vector<16x1xf32>
    %22 = tpu.concatenate %12, %18 in 1 : vector<16x1xf32>, vector<16x1xf32> -> vector<16x2xf32>
    %c0_13 = arith.constant 0 : index
    %c0_14 = arith.constant 0 : index
    %23 = vector.load %arg6[%c0_13, %c0_14] : memref<16x2xf32, #tpu.memory_space<vmem>>, vector<16x2xf32>
    tpu.vector_store %arg6[%c0_13, %c0_14], %22 {strides = array<i32>} : memref<16x2xf32, #tpu.memory_space<vmem>>, vector<16x2xf32>,
    %24 = tpu.concatenate %15, %21 in 1 : vector<16x1xf32>, vector<16x1xf32> -> vector<16x2xf32>
    %c0_15 = arith.constant 0 : index
    %c0_16 = arith.constant 0 : index
    %25 = vector.load %arg7[%c0_15, %c0_16] : memref<16x2xf32, #tpu.memory_space<vmem>>, vector<16x2xf32>
    tpu.vector_store %arg7[%c0_15, %c0_16], %24 {strides = array<i32>} : memref<16x2xf32, #tpu.memory_space<vmem>>, vector<16x2xf32>,
    return
  }
  func.func @transform_0(%arg0: i32) -> (i32, i32) {
    %c0_i32 = arith.constant 0 : i32
    %c0_i32_0 = arith.constant 0 : i32
    return %arg0, %c0_i32 : i32, i32
  }
  func.func @transform_1(%arg0: i32) -> (i32, i32) {
    %c0_i32 = arith.constant 0 : i32
    %c0_i32_0 = arith.constant 0 : i32
    %c0_i32_1 = arith.constant 0 : i32
    return %c0_i32, %c0_i32_0 : i32, i32
  }
  func.func @transform_2(%arg0: i32) -> (i32, i32) {
    %c0_i32 = arith.constant 0 : i32
    %c0_i32_0 = arith.constant 0 : i32
    %c0_i32_1 = arith.constant 0 : i32
    return %c0_i32, %c0_i32_0 : i32, i32
  }
  func.func @transform_3(%arg0: i32) -> (i32, i32) {
    %c0_i32 = arith.constant 0 : i32
    %c0_i32_0 = arith.constant 0 : i32
    %c0_i32_1 = arith.constant 0 : i32
    return %c0_i32, %c0_i32_0 : i32, i32
  }
  func.func @transform_4(%arg0: i32) -> (i32, i32) {
    %c0_i32 = arith.constant 0 : i32
    %c0_i32_0 = arith.constant 0 : i32
    return %arg0, %c0_i32 : i32, i32
  }
  func.func @transform_5(%arg0: i32) -> (i32, i32) {
    %c0_i32 = arith.constant 0 : i32
    %c0_i32_0 = arith.constant 0 : i32
    return %arg0, %c0_i32 : i32, i32
  }
  func.func @transform_6(%arg0: i32) -> (i32, i32) {
    %c0_i32 = arith.constant 0 : i32
    %c0_i32_0 = arith.constant 0 : i32
    return %arg0, %c0_i32 : i32, i32
  }
}

</mosaic_0001>

<bundles_post_ra>
// kernel: tpu_custom_call.1
= control target key start
LH: loop header
LB: loop body
LE: loop exit
PB: predicated region body
PF: predicated region fallthrough
CT: control target
= control target key end

     0   :  { %vm24_vm0 = vcmask 64512   ;;  %s329_s0 = inlined_call_operand.vmem [shape: f32[16,8], index: 0, kind: input, shape index: {}]   ;;  %s330_s1 = inlined_call_operand.vmem [shape: f32[8,16], index: 1, kind: input, shape index: {}]   ;;  %s331_s2 = inlined_call_operand.vmem [shape: f32[1,16], index: 2, kind: input, shape index: {}]   ;;  %s332_s3 = inlined_call_operand.vmem [shape: f32[1,16], index: 3, kind: input, shape index: {}]   ;;  %s333_s4 = inlined_call_operand.hbm [shape: f32[16,16], index: 4, kind: output, shape index: {0}]   ;;  %s334_s5 = inlined_call_operand.vmem [shape: f32[16,2], index: 5, kind: output, shape index: {1}]   ;;  %s335_s6 = inlined_call_operand.vmem [shape: f32[16,2], index: 6, kind: output, shape index: {2}]  }
   0x1   :  { %v23_v0 = vld [vmem:[%s330_s1] sm:$0xff]  ;;  %v22_v2 = vld [vmem:[%s329_s0 + $0x8] sm:$0xff] }
   0x2   :  { %v21_v1 = vld [vmem:[%s329_s0] sm:$0xff]  ;;  %208 = vmatprep.subr.mxu0 %v23_v0 }
   0x3   :  { %210 = vmatprep.mubr.msk.f32.mxu0 %vm24_vm0, %v21_v1 }
   0x4   :  { %12 = vsyncpa [#allocation3], 0  ;;  %209 = vmatpush3.msra.mxu0 %v23_v0  ;;  %vm106_vm1 = vcmask 130048   ;;  %v204_v3 = vld [vmem:[%s332_s3] ss:$0 sm:$0xff]  ;;  %s241_s0 = smov 120  }
   0x5   :  { %211 = vmatmul.mubr.msk.f32.vlgmr.msra.gmra.mrb[0].mxu0 %vm24_vm0, %v22_v2  ;;  %v203_v4 = vld [vmem:[%s331_s2] ss:$0 sm:$0xff]  ;;  %s242_s2 = smov [#allocation2]  }
   0x6   :  { %s182_s3 = sshll.u32 %s242_s2, 4  ;;  %s183_s3 = int_to_ptr.vmem [resolvable:$true] %s182_s3 }
   0x7   :  { %s217_s30 = scalar_lea.vmem %s183_s3, 256  ;;  %p222_p1 = scmp.lt.s32.totalorder %s183_s3, %s183_s3 }
   0x8   :  { %p218_p0 = scmp.ne.s32.totalorder %s183_s3, %s217_s30  ;;  %p223_p2 = scmp.lt.s32.totalorder %s217_s30, %s217_s30 }
   0xa   :  { %p224_p3 = por %p223_p2, %p222_p1 }
   0xc   :  { %p225_p4 = pnand %p224_p3, %p218_p0 }
  0xd8   :  { %v212_v5 = vpop.f32.mrb[0].mxu0 }
  0xd9   :  { %v97_v6 = vpop.f32.mrb[1].mxu0  ;;  %108 = vst.msk [vmem:[#allocation2 + $0x8] sm:$0xff] %vm106_vm1, %v212_v5  ;;  %v126_v9 = vmul.f32 %v212_v5, %v204_v3  ;;  %v117_v10 = vmul.f32 %v212_v5, %v203_v4 }
  0xda   :  { %107 = vst.msk [vmem:[#allocation2] sm:$0xff] %vm106_vm1, %v97_v6  ;;  %v125_v7 = vmul.f32 %v204_v3, %v97_v6  ;;  %v116_v8 = vmul.f32 %v203_v4, %v97_v6 }
  0xdb   :  { %v136_v11 = vsel %vm24_vm0, %v126_v9, 0.0  ;;  %v130_v13 = vsel %vm24_vm0, %v117_v10, 0.0 }
  0xdc   :  { %155 = vrot.lane.b32.xlu1 %v125_v7, %s241_s0  ;;  %141 = vrot.lane.b32.xlu0 %v116_v8, %s241_s0  ;;  %v127_v12 = vsel %vm24_vm0, %v116_v8, 0.0  ;;  %v133_v14 = vsel %vm24_vm0, %v125_v7, 0.0 }
  0xe0   :  { %157 = vrot.lane.b32.xlu1 %v126_v9, %s241_s0  ;;  %143 = vrot.lane.b32.xlu0 %v117_v10, %s241_s0 }
  0xff   :  { %137 = vadd.xlane.f32.xlu0 %v136_v11 }
 0x103   :  { %128 = vadd.xlane.f32.xlu0 %v127_v12 }
 0x104   :  { %131 = vadd.xlane.f32.xlu1 %v130_v13 }
 0x107   :  { %134 = vadd.xlane.f32.xlu0 %v133_v14 }
 0x14e   :  { %v156_v15 = vpop.permute.xlu1 %155  ;;  %v142_v16 = vpop.permute.xlu0 %141 }
 0x14f   :  { %v147_v17 = vsel %vm24_vm0, %v142_v16, 0.0  ;;  %v161_v19 = vsel %vm24_vm0, %v156_v15, 0.0 }
 0x150   :  { %148 = vadd.xlane.f32.xlu1 %v147_v17 }
 0x152   :  { %v144_v18 = vpop.permute.xlu0 %143  ;;  %v158_v21 = vpop.permute.xlu1 %157 }
 0x153   :  { %v150_v20 = vsel %vm24_vm0, %v144_v18, 0.0  ;;  %v164_v22 = vsel %vm24_vm0, %v158_v21, 0.0 }
 0x154   :  { %162 = vadd.xlane.f32.xlu1 %v161_v19  ;;  %151 = vadd.xlane.f32.xlu0 %v150_v20 }
 0x158   :  { %165 = vadd.xlane.f32.xlu0 %v164_v22 }
 0x159   :  { %228 = shalt.err (!%p225_p4)
}
 0x15a   :  { %s229_s9 = scalar_lea.hbm %s333_s4, 256 }
 0x15b   :  { %p230_p5 = scmp.ne.s32.totalorder %s333_s4, %s229_s9  ;;  %p233_p6 = scmp.lt.u32.totalorder %s229_s9, %s333_s4 }
 0x15d   :  { %p235_p7 = pnand %p233_p6, %p230_p5 }
 0x15f   :  { %238 = shalt.err (!%p235_p7)
}
 0x160   :  { %s243_s14 = smov 128   ;;  %s244_s15 = smov 8   ;;  %vm167_vm2 = vcmask 7168   ;;  %vm170_vm3 = vcmask 15360  }
 0x161   :  { %188 = dma.vmem_to_hbm [thread:$0]  %s183_s3, 256, %s333_s4, [#allocation3], %s243_s14, %s243_s14, %s244_s15  }
 0x18c   :  { %v138_v23 = vpop.xlane.xlu0 %137 }
 0x190   :  { %v129_v24 = vpop.xlane.xlu0 %128 }
 0x191   :  { %v132_v25 = vpop.xlane.xlu1 %131 }
 0x194   :  { %v135_v26 = vpop.xlane.xlu0 %134 }
 0x1dd   :  { %v149_v27 = vpop.xlane.xlu1 %148 }
 0x1de   :  { %v168_v28 = vsel %vm167_vm2, %v129_v24, %v149_v27 }
 0x1df   :  { %171 = vst.msk [vmem:[%s334_s5] sm:$0xff] %vm170_vm3, %v168_v28 }
 0x1e1   :  { %v163_v29 = vpop.xlane.xlu1 %162  ;;  %v152_v30 = vpop.xlane.xlu0 %151 }
 0x1e2   :  { %v173_v31 = vsel %vm167_vm2, %v135_v26, %v163_v29  ;;  %v169_v32 = vsel %vm167_vm2, %v132_v25, %v152_v30 }
 0x1e3   :  { %175 = vst.msk [vmem:[%s335_s6] sm:$0xff] %vm170_vm3, %v173_v31  ;;  %172 = vst.msk [vmem:[%s334_s5 + $0x8] sm:$0xff] %vm170_vm3, %v169_v32 }
 0x1e5   :  { %v166_v33 = vpop.xlane.xlu0 %165 }
 0x1e6   :  { %v174_v34 = vsel %vm167_vm2, %v138_v23, %v166_v33 }
 0x1e7   :  { %176 = vst.msk [vmem:[%s335_s6 + $0x8] sm:$0xff] %vm170_vm3, %v174_v34 }
 0x1e8   :  { %239 = dma.done.wait [#allocation3], 256  }
 0x1e9   :  { %240 = vsyncadd [#allocation3], 4294967040 }
 0x1ea   :  { %200 = vsyncpa [#allocation3], 1 }

</bundles_post_ra>
